<compile_context>
chip_gen: v5e
topology: v5e:2x2
jax: 0.10.0
libtpu: 0.0.40
codegen_flags: <defaults>
</compile_context>

<pallas_src>
import jax
import jax.numpy as jnp
import numpy as np
from jax.experimental import pallas as pl
from jax.experimental.pallas import tpu as pltpu

BN_EPS = 1e-5


def _round_up(a, b):
    return (a + b - 1) // b * b


def _pick_vmem_limit():
    """Generation-aware scoped-VMEM request (v7x: 64 MiB phys, v5e/v6e: 128 MiB)."""
    cap = 64 << 20
    try:
        info = pltpu.get_tpu_info()
        cap = int(getattr(info, "vmem_capacity_bytes", cap))
    except Exception:
        pass
    return int(min(max(cap // 2, 16 << 20), 96 << 20))


@jax.jit
def basic_convolution_forward(x_nchw, w_oihw, conv_b, gamma, beta):
    # conv bias is mathematically cancelled by training-mode BN mean
    # subtraction (and does not change the variance) -> not used in compute.
    del conv_b

    N, Cin, H, W = x_nchw.shape
    Cout = w_oihw.shape[0]
    Hp, Wp = H + 2, W + 2
    S = H * Wp              # flat output positions per sample (2 junk cols/row)
    SP = Hp * Wp + 2        # flat padded input length (+2 keeps tap (2,2) in-bounds)
    M = N * H * W           # true element count for BN statistics
    cout_p = _round_up(Cout, 8)
    vmem_limit = _pick_vmem_limit()

    # ---- layout glue (cheap XLA): spatial pad -> flatten -> bf16 ----
    x_pad = jnp.pad(x_nchw, ((0, 0), (0, 0), (1, 1), (1, 1)))
    x_flat = x_pad.reshape(N, Cin, Hp * Wp)
    x_flat = jnp.pad(x_flat, ((0, 0), (0, 0), (0, SP - Hp * Wp))).astype(jnp.bfloat16)

    # weights folded per tap: w_taps[t, co, ci] = w[co, ci, dh, dw], t = dh*3+dw
    w_taps = jnp.transpose(w_oihw, (2, 3, 0, 1)).reshape(9, Cout, Cin)
    w_taps = jnp.pad(w_taps, ((0, 0), (0, cout_p - Cout), (0, 0))).astype(jnp.bfloat16)

    # validity mask over flat positions m = h*Wp + w  (w < W is real data)
    mask = ((jnp.arange(S, dtype=jnp.int32) % Wp) < W).astype(jnp.float32).reshape(1, S)

    # ---------------- pass 1: implicit-im2col conv + BN partial stats ----------------
    def conv_stats_kernel(w_ref, x_ref, m_ref, y_ref, s_ref, q_ref):
        # w_ref : (9, cout_p, Cin) bf16     x_ref : (1, Cin, SP) bf16
        # m_ref : (1, S) f32                y_ref : (1, cout_p, S) f32
        # s_ref/q_ref : (1, cout_p, 1) f32  per-sample [sum] / [sum of squares]
        x = x_ref[0]                                   # (Cin, SP)
        acc = None
        for t in range(9):                             # static unroll over taps
            dh, dw = divmod(t, 3)
            off = dh * Wp + dw                         # static flat tap offset
            tap = x[:, off:off + S]                    # (Cin, S) shifted slice in VMEM
            p = jnp.dot(w_ref[t], tap, preferred_element_type=jnp.float32)
            acc = p if acc is None else acc + p        # f32 accumulator (cout_p, S)
        y_ref[0] = acc
        m = m_ref[...]                                 # (1, S) masks out junk columns
        s_ref[0] = jnp.sum(acc * m, axis=-1, keepdims=True)
        q_ref[0] = jnp.sum(acc * acc * m, axis=-1, keepdims=True)

    y, sums, sqs = pl.pallas_call(
        conv_stats_kernel,
        out_shape=(
            jax.ShapeDtypeStruct((N, cout_p, S), jnp.float32),
            jax.ShapeDtypeStruct((N, cout_p, 1), jnp.float32),
            jax.ShapeDtypeStruct((N, cout_p, 1), jnp.float32),
        ),
        grid_spec=pltpu.PrefetchScalarGridSpec(
            num_scalar_prefetch=0,
            grid=(N,),
            in_specs=[
                pl.BlockSpec((9, cout_p, Cin), lambda n: (0, 0, 0)),  # weights: resident
                pl.BlockSpec((1, Cin, SP), lambda n: (n, 0, 0)),      # per-sample slab
                pl.BlockSpec((1, S), lambda n: (0, 0)),               # mask: resident
            ],
            out_specs=(
                pl.BlockSpec((1, cout_p, S), lambda n: (n, 0, 0)),
                pl.BlockSpec((1, cout_p, 1), lambda n: (n, 0, 0)),
                pl.BlockSpec((1, cout_p, 1), lambda n: (n, 0, 0)),
            ),
        ),
        compiler_params=pltpu.CompilerParams(
            dimension_semantics=("parallel",),
            vmem_limit_bytes=vmem_limit,
        ),
    )(w_taps, x_flat, mask)

    # ---------------- tiny O(Cout) global combine: scale / shift ----------------
    mean = jnp.sum(sums[:, :, 0], axis=0) / float(M)
    var = jnp.maximum(jnp.sum(sqs[:, :, 0], axis=0) / float(M) - mean * mean, 0.0)
    inv_std = jax.lax.rsqrt(var + BN_EPS)
    gamma_p = jnp.pad(gamma.astype(jnp.float32), (0, cout_p - Cout))
    beta_p = jnp.pad(beta.astype(jnp.float32), (0, cout_p - Cout))
    scale = (gamma_p * inv_std).reshape(cout_p, 1)
    shift = (beta_p - mean * gamma_p * inv_std).reshape(cout_p, 1)

    # ---------------- pass 2: normalize + ReLU, in place over the intermediate ----------------
    def bn_relu_kernel(y_ref, sc_ref, sh_ref, o_ref):
        o_ref[...] = jnp.maximum(
            y_ref[...] * sc_ref[...] + sh_ref[...], 0.0
        ).astype(o_ref.dtype)

    alias = {0: 0} if x_nchw.dtype == jnp.float32 else {}
    out3 = pl.pallas_call(
        bn_relu_kernel,
        out_shape=jax.ShapeDtypeStruct((N, cout_p, S), x_nchw.dtype),
        grid_spec=pltpu.PrefetchScalarGridSpec(
            num_scalar_prefetch=0,
            grid=(N,),
            in_specs=[
                pl.BlockSpec((1, cout_p, S), lambda n: (n, 0, 0)),
                pl.BlockSpec((cout_p, 1), lambda n: (0, 0)),
                pl.BlockSpec((cout_p, 1), lambda n: (0, 0)),
            ],
            out_specs=pl.BlockSpec((1, cout_p, S), lambda n: (n, 0, 0)),
        ),
        compiler_params=pltpu.CompilerParams(
            dimension_semantics=("parallel",),
            vmem_limit_bytes=vmem_limit,
        ),
        input_output_aliases=alias,
    )(y, scale, shift)

    # ---- free reshape + cheap slice (drop pad columns / pad channels); no transpose ----
    return out3.reshape(N, cout_p, H, Wp)[:, :Cout, :, :W]


def reference_forward(x, w, b, gamma, beta, eps=BN_EPS):
    """Pure-JAX reference (Conv2d 'same' + training-mode BN + ReLU), NCHW."""
    y = jax.lax.conv_general_dilated(
        x, w, window_strides=(1, 1), padding="SAME",
        dimension_numbers=("NCHW", "OIHW", "NCHW"))
    y = y + b[None, :, None, None]
    mean = jnp.mean(y, axis=(0, 2, 3), keepdims=True)
    var = jnp.mean(jnp.square(y - mean), axis=(0, 2, 3), keepdims=True)
    y = (y - mean) / jnp.sqrt(var + eps)
    y = y * gamma[None, :, None, None] + beta[None, :, None, None]
    return jnp.maximum(y, 0.0)


if __name__ == "__main__":
    # Small shapes consistent with the module: N=2, Cin=4, Cout=8, H=W=16.
    N, Cin, Cout, H, W = 2, 4, 8, 16, 16

    key = jax.random.PRNGKey(0)
    k_x, k_w, k_b = jax.random.split(key, 3)

    x = jax.random.normal(k_x, (N, Cin, H, W), dtype=jnp.float32)

    # Deterministic parameter init (mimics nn.Conv2d / nn.BatchNorm2d defaults).
    fan_in = Cin * 3 * 3
    bound = 1.0 / np.sqrt(fan_in)
    conv_w = jax.random.uniform(k_w, (Cout, Cin, 3, 3), jnp.float32, -bound, bound)
    conv_b = jax.random.uniform(k_b, (Cout,), jnp.float32, -bound, bound)
    gamma = jnp.ones((Cout,), jnp.float32)
    beta = jnp.zeros((Cout,), jnp.float32)

    out = jax.block_until_ready(basic_convolution_forward(x, conv_w, conv_b, gamma, beta))
    ref = jax.block_until_ready(reference_forward(x, conv_w, conv_b, gamma, beta))

    # bf16 MXU operands (per perf guidance) -> slightly looser tolerance than pure f32.
    np.testing.assert_allclose(np.asarray(out), np.asarray(ref), atol=2e-2, rtol=2e-2)

    assert out.shape == (N, Cout, H, W)
    print("KERNEL_OK")
</pallas_src>

<mosaic_0001>
module attributes {stable_mosaic.version = 11 : i64} {
  func.func @bn_relu_kernel(%arg0: i32, %arg1: memref<1x8x288xf32, #tpu.memory_space<vmem>>, %arg2: memref<8x1xf32, #tpu.memory_space<vmem>>, %arg3: memref<8x1xf32, #tpu.memory_space<vmem>>, %arg4: memref<1x8x288xf32, #tpu.memory_space<vmem>>) attributes {dimension_semantics = [#tpu.dimension_semantics<parallel>], iteration_bounds = array<i64: 2>, scalar_prefetch = 0 : i64, scratch_operands = 0 : i64, tpu.core_type = #tpu.core_type<tc>, window_params = [{transform_indices = @transform_0, window_bounds = array<i64: 1, 8, 288>}, {pipeline_mode = #tpu.pipeline_mode<synchronous>, transform_indices = @transform_1, window_bounds = array<i64: 8, 1>}, {pipeline_mode = #tpu.pipeline_mode<synchronous>, transform_indices = @transform_2, window_bounds = array<i64: 8, 1>}, {transform_indices = @transform_3, window_bounds = array<i64: 1, 8, 288>}]} {
    %c0 = arith.constant 0 : index
    %c0_0 = arith.constant 0 : index
    %c0_1 = arith.constant 0 : index
    %0 = vector.load %arg1[%c0, %c0_0, %c0_1] : memref<1x8x288xf32, #tpu.memory_space<vmem>>, vector<1x8x288xf32>
    %c0_2 = arith.constant 0 : index
    %c0_3 = arith.constant 0 : index
    %1 = vector.load %arg2[%c0_2, %c0_3] : memref<8x1xf32, #tpu.memory_space<vmem>>, vector<8x1xf32>
    %2 = vector.shape_cast %1 : vector<8x1xf32> to vector<1x8x1xf32>
    %3 = vector.broadcast %2 : vector<1x8x1xf32> to vector<1x8x288xf32>
    %4 = arith.mulf %0, %3 : vector<1x8x288xf32>
    %c0_4 = arith.constant 0 : index
    %c0_5 = arith.constant 0 : index
    %5 = vector.load %arg3[%c0_4, %c0_5] : memref<8x1xf32, #tpu.memory_space<vmem>>, vector<8x1xf32>
    %6 = vector.shape_cast %5 : vector<8x1xf32> to vector<1x8x1xf32>
    %7 = vector.broadcast %6 : vector<1x8x1xf32> to vector<1x8x288xf32>
    %8 = arith.addf %4, %7 : vector<1x8x288xf32>
    %cst = arith.constant 0.000000e+00 : f32
    %9 = vector.broadcast %cst : f32 to vector<1x8x288xf32>
    %10 = arith.maximumf %8, %9 : vector<1x8x288xf32>
    %c0_6 = arith.constant 0 : index
    %c0_7 = arith.constant 0 : index
    %c0_8 = arith.constant 0 : index
    %11 = vector.load %arg4[%c0_6, %c0_7, %c0_8] : memref<1x8x288xf32, #tpu.memory_space<vmem>>, vector<1x8x288xf32>
    tpu.vector_store %arg4[%c0_6, %c0_7, %c0_8], %10 {strides = array<i32>} : memref<1x8x288xf32, #tpu.memory_space<vmem>>, vector<1x8x288xf32>,
    return
  }
  func.func @transform_0(%arg0: i32) -> (i32, i32, i32) {
    %c0_i32 = arith.constant 0 : i32
    %c0_i32_0 = arith.constant 0 : i32
    %c0_i32_1 = arith.constant 0 : i32
    return %arg0, %c0_i32, %c0_i32_0 : i32, i32, i32
  }
  func.func @transform_1(%arg0: i32) -> (i32, i32) {
    %c0_i32 = arith.constant 0 : i32
    %c0_i32_0 = arith.constant 0 : i32
    %c0_i32_1 = arith.constant 0 : i32
    return %c0_i32, %c0_i32_0 : i32, i32
  }
  func.func @transform_2(%arg0: i32) -> (i32, i32) {
    %c0_i32 = arith.constant 0 : i32
    %c0_i32_0 = arith.constant 0 : i32
    %c0_i32_1 = arith.constant 0 : i32
    return %c0_i32, %c0_i32_0 : i32, i32
  }
  func.func @transform_3(%arg0: i32) -> (i32, i32, i32) {
    %c0_i32 = arith.constant 0 : i32
    %c0_i32_0 = arith.constant 0 : i32
    %c0_i32_1 = arith.constant 0 : i32
    return %arg0, %c0_i32, %c0_i32_0 : i32, i32, i32
  }
}

module attributes {stable_mosaic.version = 11 : i64} {
  func.func @conv_stats_kernel(%arg0: i32, %arg1: memref<9x8x4xbf16, #tpu.memory_space<vmem>>, %arg2: memref<1x4x326xbf16, #tpu.memory_space<vmem>>, %arg3: memref<1x288xf32, #tpu.memory_space<vmem>>, %arg4: memref<1x8x288xf32, #tpu.memory_space<vmem>>, %arg5: memref<1x8x1xf32, #tpu.memory_space<vmem>>, %arg6: memref<1x8x1xf32, #tpu.memory_space<vmem>>) attributes {dimension_semantics = [#tpu.dimension_semantics<parallel>], iteration_bounds = array<i64: 2>, scalar_prefetch = 0 : i64, scratch_operands = 0 : i64, tpu.core_type = #tpu.core_type<tc>, window_params = [{pipeline_mode = #tpu.pipeline_mode<synchronous>, transform_indices = @transform_0, window_bounds = array<i64: 9, 8, 4>}, {transform_indices = @transform_1, window_bounds = array<i64: 1, 4, 326>}, {pipeline_mode = #tpu.pipeline_mode<synchronous>, transform_indices = @transform_2, window_bounds = array<i64: 1, 288>}, {transform_indices = @transform_3, window_bounds = array<i64: 1, 8, 288>}, {transform_indices = @transform_4, window_bounds = array<i64: 1, 8, 1>}, {transform_indices = @transform_5, window_bounds = array<i64: 1, 8, 1>}]} {
    %c0 = arith.constant 0 : index
    %c0_0 = arith.constant 0 : index
    %c0_1 = arith.constant 0 : index
    %0 = vector.load %arg2[%c0, %c0_0, %c0_1] : memref<1x4x326xbf16, #tpu.memory_space<vmem>>, vector<1x4x326xbf16>
    %1 = vector.shape_cast %0 : vector<1x4x326xbf16> to vector<4x326xbf16>
    %2 = vector.extract_strided_slice %1 {offsets = [0, 0], sizes = [4, 288], strides = [1, 1]} : vector<4x326xbf16> to vector<4x288xbf16>
    %c0_2 = arith.constant 0 : index
    %c0_3 = arith.constant 0 : index
    %c0_4 = arith.constant 0 : index
    %3 = vector.load %arg1[%c0_2, %c0_3, %c0_4] : memref<9x8x4xbf16, #tpu.memory_space<vmem>>, vector<1x8x4xbf16>
    %4 = vector.shape_cast %3 : vector<1x8x4xbf16> to vector<8x4xbf16>
    %cst = arith.constant dense<0.000000e+00> : vector<8x288xf32>
    %5 = tpu.matmul %4, %2, %cst {dimension_numbers = #tpu.dot_dimension_numbers<[1], [0], [0], [1], [0, 0, 1, 1], [], []>} : vector<8x4xbf16>, vector<4x288xbf16>, vector<8x288xf32> -> vector<8x288xf32>
    %6 = vector.extract_strided_slice %1 {offsets = [0, 1], sizes = [4, 288], strides = [1, 1]} : vector<4x326xbf16> to vector<4x288xbf16>
    %c1 = arith.constant 1 : index
    %c0_5 = arith.constant 0 : index
    %c0_6 = arith.constant 0 : index
    %7 = vector.load %arg1[%c1, %c0_5, %c0_6] : memref<9x8x4xbf16, #tpu.memory_space<vmem>>, vector<1x8x4xbf16>
    %8 = vector.shape_cast %7 : vector<1x8x4xbf16> to vector<8x4xbf16>
    %cst_7 = arith.constant dense<0.000000e+00> : vector<8x288xf32>
    %9 = tpu.matmul %8, %6, %cst_7 {dimension_numbers = #tpu.dot_dimension_numbers<[1], [0], [0], [1], [0, 0, 1, 1], [], []>} : vector<8x4xbf16>, vector<4x288xbf16>, vector<8x288xf32> -> vector<8x288xf32>
    %10 = arith.addf %5, %9 : vector<8x288xf32>
    %11 = vector.extract_strided_slice %1 {offsets = [0, 2], sizes = [4, 288], strides = [1, 1]} : vector<4x326xbf16> to vector<4x288xbf16>
    %c2 = arith.constant 2 : index
    %c0_8 = arith.constant 0 : index
    %c0_9 = arith.constant 0 : index
    %12 = vector.load %arg1[%c2, %c0_8, %c0_9] : memref<9x8x4xbf16, #tpu.memory_space<vmem>>, vector<1x8x4xbf16>
    %13 = vector.shape_cast %12 : vector<1x8x4xbf16> to vector<8x4xbf16>
    %cst_10 = arith.constant dense<0.000000e+00> : vector<8x288xf32>
    %14 = tpu.matmul %13, %11, %cst_10 {dimension_numbers = #tpu.dot_dimension_numbers<[1], [0], [0], [1], [0, 0, 1, 1], [], []>} : vector<8x4xbf16>, vector<4x288xbf16>, vector<8x288xf32> -> vector<8x288xf32>
    %15 = arith.addf %10, %14 : vector<8x288xf32>
    %16 = vector.extract_strided_slice %1 {offsets = [0, 18], sizes = [4, 288], strides = [1, 1]} : vector<4x326xbf16> to vector<4x288xbf16>
    %c3 = arith.constant 3 : index
    %c0_11 = arith.constant 0 : index
    %c0_12 = arith.constant 0 : index
    %17 = vector.load %arg1[%c3, %c0_11, %c0_12] : memref<9x8x4xbf16, #tpu.memory_space<vmem>>, vector<1x8x4xbf16>
    %18 = vector.shape_cast %17 : vector<1x8x4xbf16> to vector<8x4xbf16>
    %cst_13 = arith.constant dense<0.000000e+00> : vector<8x288xf32>
    %19 = tpu.matmul %18, %16, %cst_13 {dimension_numbers = #tpu.dot_dimension_numbers<[1], [0], [0], [1], [0, 0, 1, 1], [], []>} : vector<8x4xbf16>, vector<4x288xbf16>, vector<8x288xf32> -> vector<8x288xf32>
    %20 = arith.addf %15, %19 : vector<8x288xf32>
    %21 = vector.extract_strided_slice %1 {offsets = [0, 19], sizes = [4, 288], strides = [1, 1]} : vector<4x326xbf16> to vector<4x288xbf16>
    %c4 = arith.constant 4 : index
    %c0_14 = arith.constant 0 : index
    %c0_15 = arith.constant 0 : index
    %22 = vector.load %arg1[%c4, %c0_14, %c0_15] : memref<9x8x4xbf16, #tpu.memory_space<vmem>>, vector<1x8x4xbf16>
    %23 = vector.shape_cast %22 : vector<1x8x4xbf16> to vector<8x4xbf16>
    %cst_16 = arith.constant dense<0.000000e+00> : vector<8x288xf32>
    %24 = tpu.matmul %23, %21, %cst_16 {dimension_numbers = #tpu.dot_dimension_numbers<[1], [0], [0], [1], [0, 0, 1, 1], [], []>} : vector<8x4xbf16>, vector<4x288xbf16>, vector<8x288xf32> -> vector<8x288xf32>
    %25 = arith.addf %20, %24 : vector<8x288xf32>
    %26 = vector.extract_strided_slice %1 {offsets = [0, 20], sizes = [4, 288], strides = [1, 1]} : vector<4x326xbf16> to vector<4x288xbf16>
    %c5 = arith.constant 5 : index
    %c0_17 = arith.constant 0 : index
    %c0_18 = arith.constant 0 : index
    %27 = vector.load %arg1[%c5, %c0_17, %c0_18] : memref<9x8x4xbf16, #tpu.memory_space<vmem>>, vector<1x8x4xbf16>
    %28 = vector.shape_cast %27 : vector<1x8x4xbf16> to vector<8x4xbf16>
    %cst_19 = arith.constant dense<0.000000e+00> : vector<8x288xf32>
    %29 = tpu.matmul %28, %26, %cst_19 {dimension_numbers = #tpu.dot_dimension_numbers<[1], [0], [0], [1], [0, 0, 1, 1], [], []>} : vector<8x4xbf16>, vector<4x288xbf16>, vector<8x288xf32> -> vector<8x288xf32>
    %30 = arith.addf %25, %29 : vector<8x288xf32>
    %31 = vector.extract_strided_slice %1 {offsets = [0, 36], sizes = [4, 288], strides = [1, 1]} : vector<4x326xbf16> to vector<4x288xbf16>
    %c6 = arith.constant 6 : index
    %c0_20 = arith.constant 0 : index
    %c0_21 = arith.constant 0 : index
    %32 = vector.load %arg1[%c6, %c0_20, %c0_21] : memref<9x8x4xbf16, #tpu.memory_space<vmem>>, vector<1x8x4xbf16>
    %33 = vector.shape_cast %32 : vector<1x8x4xbf16> to vector<8x4xbf16>
    %cst_22 = arith.constant dense<0.000000e+00> : vector<8x288xf32>
    %34 = tpu.matmul %33, %31, %cst_22 {dimension_numbers = #tpu.dot_dimension_numbers<[1], [0], [0], [1], [0, 0, 1, 1], [], []>} : vector<8x4xbf16>, vector<4x288xbf16>, vector<8x288xf32> -> vector<8x288xf32>
    %35 = arith.addf %30, %34 : vector<8x288xf32>
    %36 = vector.extract_strided_slice %1 {offsets = [0, 37], sizes = [4, 288], strides = [1, 1]} : vector<4x326xbf16> to vector<4x288xbf16>
    %c7 = arith.constant 7 : index
    %c0_23 = arith.constant 0 : index
    %c0_24 = arith.constant 0 : index
    %37 = vector.load %arg1[%c7, %c0_23, %c0_24] : memref<9x8x4xbf16, #tpu.memory_space<vmem>>, vector<1x8x4xbf16>
    %38 = vector.shape_cast %37 : vector<1x8x4xbf16> to vector<8x4xbf16>
    %cst_25 = arith.constant dense<0.000000e+00> : vector<8x288xf32>
    %39 = tpu.matmul %38, %36, %cst_25 {dimension_numbers = #tpu.dot_dimension_numbers<[1], [0], [0], [1], [0, 0, 1, 1], [], []>} : vector<8x4xbf16>, vector<4x288xbf16>, vector<8x288xf32> -> vector<8x288xf32>
    %40 = arith.addf %35, %39 : vector<8x288xf32>
    %41 = vector.extract_strided_slice %1 {offsets = [0, 38], sizes = [4, 288], strides = [1, 1]} : vector<4x326xbf16> to vector<4x288xbf16>
    %c8 = arith.constant 8 : index
    %c0_26 = arith.constant 0 : index
    %c0_27 = arith.constant 0 : index
    %42 = vector.load %arg1[%c8, %c0_26, %c0_27] : memref<9x8x4xbf16, #tpu.memory_space<vmem>>, vector<1x8x4xbf16>
    %43 = vector.shape_cast %42 : vector<1x8x4xbf16> to vector<8x4xbf16>
    %cst_28 = arith.constant dense<0.000000e+00> : vector<8x288xf32>
    %44 = tpu.matmul %43, %41, %cst_28 {dimension_numbers = #tpu.dot_dimension_numbers<[1], [0], [0], [1], [0, 0, 1, 1], [], []>} : vector<8x4xbf16>, vector<4x288xbf16>, vector<8x288xf32> -> vector<8x288xf32>
    %45 = arith.addf %40, %44 : vector<8x288xf32>
    %c0_29 = arith.constant 0 : index
    %c0_30 = arith.constant 0 : index
    %c0_31 = arith.constant 0 : index
    %46 = vector.load %arg4[%c0_29, %c0_30, %c0_31] : memref<1x8x288xf32, #tpu.memory_space<vmem>>, vector<1x8x288xf32>
    %47 = vector.shape_cast %46 : vector<1x8x288xf32> to vector<8x288xf32>
    %48 = vector.shape_cast %45 : vector<8x288xf32> to vector<1x8x288xf32>
    tpu.vector_store %arg4[%c0_29, %c0_30, %c0_31], %48 {strides = array<i32>} : memref<1x8x288xf32, #tpu.memory_space<vmem>>, vector<1x8x288xf32>,
    %c0_32 = arith.constant 0 : index
    %c0_33 = arith.constant 0 : index
    %49 = vector.load %arg3[%c0_32, %c0_33] : memref<1x288xf32, #tpu.memory_space<vmem>>, vector<1x288xf32>
    %50 = vector.broadcast %49 : vector<1x288xf32> to vector<8x288xf32>
    %51 = arith.mulf %45, %50 : vector<8x288xf32>
    %cst_34 = arith.constant dense<0.000000e+00> : vector<8xf32>
    %52 = vector.multi_reduction <add>, %51, %cst_34 [1] : vector<8x288xf32> to vector<8xf32>
    %53 = vector.shape_cast %52 : vector<8xf32> to vector<8x1xf32>
    %c0_35 = arith.constant 0 : index
    %c0_36 = arith.constant 0 : index
    %c0_37 = arith.constant 0 : index
    %54 = vector.load %arg5[%c0_35, %c0_36, %c0_37] : memref<1x8x1xf32, #tpu.memory_space<vmem>>, vector<1x8x1xf32>
    %55 = vector.shape_cast %54 : vector<1x8x1xf32> to vector<8x1xf32>
    %56 = vector.shape_cast %53 : vector<8x1xf32> to vector<1x8x1xf32>
    tpu.vector_store %arg5[%c0_35, %c0_36, %c0_37], %56 {strides = array<i32>} : memref<1x8x1xf32, #tpu.memory_space<vmem>>, vector<1x8x1xf32>,
    %57 = arith.mulf %45, %45 : vector<8x288xf32>
    %58 = vector.broadcast %49 : vector<1x288xf32> to vector<8x288xf32>
    %59 = arith.mulf %57, %58 : vector<8x288xf32>
    %cst_38 = arith.constant dense<0.000000e+00> : vector<8xf32>
    %60 = vector.multi_reduction <add>, %59, %cst_38 [1] : vector<8x288xf32> to vector<8xf32>
    %61 = vector.shape_cast %60 : vector<8xf32> to vector<8x1xf32>
    %c0_39 = arith.constant 0 : index
    %c0_40 = arith.constant 0 : index
    %c0_41 = arith.constant 0 : index
    %62 = vector.load %arg6[%c0_39, %c0_40, %c0_41] : memref<1x8x1xf32, #tpu.memory_space<vmem>>, vector<1x8x1xf32>
    %63 = vector.shape_cast %62 : vector<1x8x1xf32> to vector<8x1xf32>
    %64 = vector.shape_cast %61 : vector<8x1xf32> to vector<1x8x1xf32>
    tpu.vector_store %arg6[%c0_39, %c0_40, %c0_41], %64 {strides = array<i32>} : memref<1x8x1xf32, #tpu.memory_space<vmem>>, vector<1x8x1xf32>,
    return
  }
  func.func @transform_0(%arg0: i32) -> (i32, i32, i32) {
    %c0_i32 = arith.constant 0 : i32
    %c0_i32_0 = arith.constant 0 : i32
    %c0_i32_1 = arith.constant 0 : i32
    %c0_i32_2 = arith.constant 0 : i32
    return %c0_i32, %c0_i32_0, %c0_i32_1 : i32, i32, i32
  }
  func.func @transform_1(%arg0: i32) -> (i32, i32, i32) {
    %c0_i32 = arith.constant 0 : i32
    %c0_i32_0 = arith.constant 0 : i32
    %c0_i32_1 = arith.constant 0 : i32
    return %arg0, %c0_i32, %c0_i32_0 : i32, i32, i32
  }
  func.func @transform_2(%arg0: i32) -> (i32, i32) {
    %c0_i32 = arith.constant 0 : i32
    %c0_i32_0 = arith.constant 0 : i32
    %c0_i32_1 = arith.constant 0 : i32
    return %c0_i32, %c0_i32_0 : i32, i32
  }
  func.func @transform_3(%arg0: i32) -> (i32, i32, i32) {
    %c0_i32 = arith.constant 0 : i32
    %c0_i32_0 = arith.constant 0 : i32
    %c0_i32_1 = arith.constant 0 : i32
    return %arg0, %c0_i32, %c0_i32_0 : i32, i32, i32
  }
  func.func @transform_4(%arg0: i32) -> (i32, i32, i32) {
    %c0_i32 = arith.constant 0 : i32
    %c0_i32_0 = arith.constant 0 : i32
    %c0_i32_1 = arith.constant 0 : i32
    return %arg0, %c0_i32, %c0_i32_0 : i32, i32, i32
  }
  func.func @transform_5(%arg0: i32) -> (i32, i32, i32) {
    %c0_i32 = arith.constant 0 : i32
    %c0_i32_0 = arith.constant 0 : i32
    %c0_i32_1 = arith.constant 0 : i32
    return %arg0, %c0_i32, %c0_i32_0 : i32, i32, i32
  }
}

</mosaic_0001>

<bundles_post_ra>
// kernel: basic_convolution_forward.3
= control target key start
LH: loop header
LB: loop body
LE: loop exit
PB: predicated region body
PF: predicated region fallthrough
CT: control target
= control target key end

     0   :  { %s303_s12 = smov 0   ;;  %s326_s0 = inlined_call_operand.vmem [shape: f32[2,8,288], index: 0, kind: input, shape index: {}, may-alias: {0,3}]   ;;  %s327_s1 = inlined_call_operand.vmem [shape: f32[8,1], index: 1, kind: input, shape index: {}]   ;;  %s328_s2 = inlined_call_operand.vmem [shape: f32[8,1], index: 2, kind: input, shape index: {}]   ;;  %s329_s3 = inlined_call_operand.vmem [shape: f32[2,8,288], index: 3, kind: output, shape index: {}, may-alias: {0,3}]  }
   0x1 LB: > { %s254_s13 = sadd.s32 4294967295, %s280_s12   ;;  %p258_p0 = scmp.ge.s32.totalorder %s280_s12, 1  ;;  %s280_s12 = sphi %s303_s12, %s13_s12  }
   0x2   : > { %p137_p1 = scmp.lt.s32.totalorder %s280_s12, 3 }
   0x4   : > { %p138_p2 = pnand %p258_p0, %p137_p1 }
   0x5   : > { %p161_p3 = scmp.lt.s32.totalorder (!%p138_p2), %s254_s13, 1 }
   0x6   : > { %141 = sbr.rel (%p138_p2) target bundleno = 143 (0x8f), region = 32 }
   0xb   : > { %v174_v0 = vld [vmem:[%s327_s1] sm:$0xff]  ;;  %v282_v1 = vmov 0   ;;  %s331_s13 = smov (!%p161_p3, %s254_s13), 1  ;;  %vm197_vm0 = vcmask 261120  }
   0xc   : > { %273 = vset.pattern.permute.xlu0 %v282_v1  ;;  %v183_v2 = vld [vmem:[%s328_s2] sm:$0xff]  ;;  %s263_s18 = smul.u32 24, %s331_s13 }
   0xd   : > { %177 = vperm.xlu0 %273, %v174_v0  }
   0xe   : > { %s165_s21 = scalar_lea.vmem %s326_s0, %s263_s18  ;;  %s170_s24 = scalar_lea.vmem %s329_s3, %s263_s18 }
   0xf   : > { %v171_v4 = vld [vmem:[%s165_s21] sm:$0xff]  ;;  %v172_v5 = vld [vmem:[%s165_s21 + $0x8] sm:$0xff]  ;;  %v173_v6 = vld [vmem:[%s165_s21 + $0x10] sm:$0xff] }
  0x15   : > { %186 = vperm.xlu0 %273, %v183_v2  }
  0x7f   : > { %v178_v3 = vpop.permute.xlu0 %177 }
  0x80   : > { %v180_v7 = vmul.f32 %v178_v3, %v171_v4  ;;  %v181_v8 = vmul.f32 %v178_v3, %v172_v5  ;;  %v182_v9 = vmul.f32 %v178_v3, %v173_v6 }
  0x87   : > { %v187_v10 = vpop.permute.xlu0 %186 }
  0x88   : > { %v189_v11 = vadd.f32 %v187_v10, %v180_v7  ;;  %v190_v12 = vadd.f32 %v187_v10, %v181_v8  ;;  %v191_v13 = vadd.f32 %v187_v10, %v182_v9 }
  0x8a   : > { %v192_v14 = vmax.f32 %v189_v11, 0.0  ;;  %v193_v15 = vmax.f32 %v190_v12, 0.0  ;;  %v194_v16 = vmax.f32 %v191_v13, 0.0 }
  0x8c   : > { %195 = vst [vmem:[%s170_s24] sm:$0xff] %v192_v14 }
  0x8d   : > { %196 = vst [vmem:[%s170_s24 + $0x8] sm:$0xff] %v193_v15 }
  0x8e   : > { %198 = vst.msk [vmem:[%s170_s24 + $0x10] sm:$0xff] %vm197_vm0, %v194_v16 }
  0x8f PF: > { %s13_s12 = sadd.s32 1, %s280_s12  }
  0x90   : > { %p10_p4 = scmp.ge.s32.totalorder %s13_s12, 4  }
  0x92   :  { %12 = sbr.rel (!%p10_p4) target bundleno = 1 (0x1), region = 62 }

// kernel: basic_convolution_forward.2
= control target key start
LH: loop header
LB: loop body
LE: loop exit
PB: predicated region body
PF: predicated region fallthrough
CT: control target
= control target key end

     0   :  { %s1138_s18 = smov 0   ;;  %s1263_s0 = inlined_call_operand.vmem [shape: bf16[9,8,4], index: 0, kind: input, shape index: {}]   ;;  %s1264_s1 = inlined_call_operand.vmem [shape: bf16[2,4,326], index: 1, kind: input, shape index: {}]   ;;  %s1265_s2 = inlined_call_operand.vmem [shape: f32[1,288], index: 2, kind: input, shape index: {}]   ;;  %s1266_s3 = inlined_call_operand.vmem [shape: f32[2,8,288], index: 3, kind: output, shape index: {0}]   ;;  %s1267_s4 = inlined_call_operand.vmem [shape: f32[2,8,1], index: 4, kind: output, shape index: {1}]   ;;  %s1268_s5 = inlined_call_operand.vmem [shape: f32[2,8,1], index: 5, kind: output, shape index: {2}]  }
   0x1 LB: > { %s1028_s19 = sadd.s32 4294967295, %s1098_s18   ;;  %p1032_p0 = scmp.ge.s32.totalorder %s1098_s18, 1  ;;  %s1098_s18 = sphi %s1138_s18, %s16_s18  }
   0x2   : > { %p192_p1 = scmp.lt.s32.totalorder %s1098_s18, 3 }
   0x4   : > { %p193_p2 = pnand %p1032_p0, %p192_p1 }
   0x5   : > { %p228_p3 = scmp.lt.s32.totalorder (!%p193_p2), %s1028_s19, 1  ;;  %s1100_s24 = smov (!%p193_p2), 127  }
   0x6   : > { %196 = sbr.rel (%p193_p2) target bundleno = 501 (0x1f5), region = 32  ;;  %s1101_s25 = smov (!%p193_p2), 126  }
   0x7   : > { %s1102_s26 = smov (!%p193_p2), 110   ;;  %s1103_s27 = smov (!%p193_p2), 109  }
   0x8   : > { %s1104_s28 = smov (!%p193_p2), 108   ;;  %s1105_s29 = smov (!%p193_p2), 92  }
   0x9   : > { %s1106_s30 = smov (!%p193_p2), 91   ;;  %s1107_s6 = smov (!%p193_p2), 90  }
   0xb   : > { %s1270_s19 = smov (!%p228_p3, %s1028_s19), 1  ;;  %vm272_vm0 = vcmask 1041408   ;;  %v248_v29 = vld [vmem:[%s1263_s0] sm:$0xf]  ;;  %vm268_vm1 = vcmask 31744   ;;  %vm265_vm2 = vcmask 1039360  }
   0xc   : > { %s1074_s20 = smul.u32 6, %s1270_s19  ;;  %v1037_v37 = vld [vmem:[%s1263_s0 + $0x4] sm:$0xf]  ;;  %vm388_vm3 = vcmask 1031168   ;;  %v1044_v41 = vld [vmem:[%s1263_s0 + $0x8] sm:$0xf] }
   0xd   : > { %vm460_vm4 = vcmask 900096   ;;  %v1048_v58 = vld [vmem:[%s1263_s0 + $0xc] sm:$0xf]  ;;  %vm532_vm5 = vcmask 891904   ;;  %vm604_vm6 = vcmask 883712   ;;  %vm676_vm7 = vcmask 752640  }
   0xe   : > { %s232_s23 = scalar_lea.vmem %s1264_s1, %s1074_s20  ;;  %vm748_vm8 = vcmask 744448   ;;  %vm820_vm9 = vcmask 736256   ;;  %vm879_vm10 = vcmask 261120   ;;  %s1035_s8 = sshll.u32 %s1270_s19, 3  ;;  %vm897_vm11 = vcmask 7168  }
   0xf   : > { %v247_v0 = vld [vmem:[%s232_s23] sm:$0x3f]  ;;  %s241_s11 = scalar_lea.vmem %s1267_s4, %s1035_s8  ;;  %s245_s14 = scalar_lea.vmem %s1268_s5, %s1035_s8 }
  0x10   : > { %252 = vst [vmem:[#allocation1] ss:$4 sm:$0xff] %v247_v0 }
  0x17   : > { %v257_v1 = vld.sshfl [vmem:[#allocation1 + $0x10] sm:$0xff pattern:$0x73625140]  ;;  %v255_v2 = vld.sshfl [vmem:[#allocation1 + $0x8] sm:$0xff pattern:$0x73625140] }
  0x18   : > { %263 = vrot.lane.b32.xlu0 %v257_v1, %s1100_s24  ;;  %261 = vrot.lane.b32.xlu1 %v255_v2, %s1100_s24  ;;  %v253_v3 = vld.sshfl [vmem:[#allocation1] sm:$0xff pattern:$0x73625140] }
  0x19   : > { %321 = vst [vmem:[#allocation1] ss:$4 sm:$0xff] %v247_v0 }
  0x20   : > { %259 = vrot.lane.b32.xlu0 %v253_v3, %s1100_s24  ;;  %v322_v4 = vld.sshfl [vmem:[#allocation1] sm:$0xff pattern:$0x73625140]  ;;  %v1152_v5 = vld.sshfl [vmem:[#allocation1 + $0x8] sm:$0xff pattern:$0x73625140] }
  0x21   : > { %v1154_v6 = vld.sshfl [vmem:[#allocation1 + $0x10] sm:$0xff pattern:$0x73625140]  ;;  %v328_v28 = vsel %vm272_vm0, %v322_v4, 0  ;;  %v330_v44 = vsel %vm272_vm0, %v1152_v5, 0 }
  0x22   : > { %375 = vst [vmem:[#allocation1] ss:$4 sm:$0xff] %v247_v0  ;;  %341 = vmatpush.bf16.msra.mxu3 %v328_v28  ;;  %v332_v35 = vsel %vm272_vm0, %v1154_v6, 0 }
  0x25   : > { %1041 = vmatmul.msk.bf16.vlgmr.msra.gmra.mxu3 %vm268_vm1, %v248_v29 }
  0x29   : > { %v376_v7 = vld.sshfl [vmem:[#allocation1] sm:$0xff pattern:$0x73625140]  ;;  %v378_v8 = vld.sshfl [vmem:[#allocation1 + $0x8] sm:$0xff pattern:$0x73625140] }
  0x2a   : > { %382 = vrot.lane.b32.xlu1 %v376_v7, %s1101_s25  ;;  %384 = vrot.lane.b32.xlu2 %v378_v8, %s1101_s25  ;;  %v380_v9 = vld.sshfl [vmem:[#allocation1 + $0x10] sm:$0xff pattern:$0x73625140] }
  0x2b   : > { %447 = vst [vmem:[#allocation1] ss:$4 sm:$0xff] %v247_v0  ;;  %v1056_v8 = vld [vmem:[%s1263_s0 + $0x14] sm:$0xf] }
  0x32   : > { %v452_v10 = vld.sshfl [vmem:[#allocation1 + $0x10] sm:$0xff pattern:$0x73625140]  ;;  %v448_v11 = vld.sshfl [vmem:[#allocation1] sm:$0xff pattern:$0x73625140]  ;;  %386 = vrot.lane.b32.xlu2 %v380_v9, %s1101_s25 }
  0x33   : > { %458 = vrot.lane.b32.xlu1 %v452_v10, %s1102_s26  ;;  %v450_v12 = vld.sshfl [vmem:[#allocation1 + $0x8] sm:$0xff pattern:$0x73625140]  ;;  %v1052_v9 = vld [vmem:[%s1263_s0 + $0x10] sm:$0xf] }
  0x34   : > { %456 = vrot.lane.b32.xlu0 %v450_v12, %s1102_s26  ;;  %519 = vst [vmem:[#allocation1] ss:$4 sm:$0xff] %v247_v0 }
  0x3a   : > { %454 = vrot.lane.b32.xlu2 %v448_v11, %s1102_s26 }
  0x3b   : > { %v524_v13 = vld.sshfl [vmem:[#allocation1 + $0x10] sm:$0xff pattern:$0x73625140]  ;;  %v522_v14 = vld.sshfl [vmem:[#allocation1 + $0x8] sm:$0xff pattern:$0x73625140] }
  0x3c   : > { %530 = vrot.lane.b32.xlu0 %v524_v13, %s1103_s27  ;;  %v520_v15 = vld.sshfl [vmem:[#allocation1] sm:$0xff pattern:$0x73625140] }
  0x3d   : > { %526 = vrot.lane.b32.xlu1 %v520_v15, %s1103_s27  ;;  %591 = vst [vmem:[#allocation1] ss:$4 sm:$0xff] %v247_v0 }
  0x42   : > { %528 = vrot.lane.b32.xlu2 %v522_v14, %s1103_s27  ;;  %s1075_s27 = smul.u32 24, %s1270_s19 }
  0x44   : > { %v594_v16 = vld.sshfl [vmem:[#allocation1 + $0x8] sm:$0xff pattern:$0x73625140]  ;;  %v592_v17 = vld.sshfl [vmem:[#allocation1] sm:$0xff pattern:$0x73625140] }
  0x45   : > { %600 = vrot.lane.b32.xlu1 %v594_v16, %s1104_s28  ;;  %598 = vrot.lane.b32.xlu0 %v592_v17, %s1104_s28  ;;  %v596_v18 = vld.sshfl [vmem:[#allocation1 + $0x10] sm:$0xff pattern:$0x73625140] }
  0x46   : > { %663 = vst [vmem:[#allocation1] ss:$4 sm:$0xff] %v247_v0 }
  0x4d   : > { %602 = vrot.lane.b32.xlu1 %v596_v18, %s1104_s28  ;;  %v668_v19 = vld.sshfl [vmem:[#allocation1 + $0x10] sm:$0xff pattern:$0x73625140]  ;;  %v666_v20 = vld.sshfl [vmem:[#allocation1 + $0x8] sm:$0xff pattern:$0x73625140] }
  0x4e   : > { %672 = vrot.lane.b32.xlu0 %v666_v20, %s1105_s29  ;;  %v664_v21 = vld.sshfl [vmem:[#allocation1] sm:$0xff pattern:$0x73625140] }
  0x4f   : > { %670 = vrot.lane.b32.xlu2 %v664_v21, %s1105_s29  ;;  %735 = vst [vmem:[#allocation1] ss:$4 sm:$0xff] %v247_v0 }
  0x56   : > { %v736_v22 = vld.sshfl [vmem:[#allocation1] sm:$0xff pattern:$0x73625140]  ;;  %v740_v23 = vld.sshfl [vmem:[#allocation1 + $0x10] sm:$0xff pattern:$0x73625140] }
  0x57   : > { %746 = vrot.lane.b32.xlu1 %v740_v23, %s1106_s30  ;;  %v738_v24 = vld.sshfl [vmem:[#allocation1 + $0x8] sm:$0xff pattern:$0x73625140]  ;;  %674 = vrot.lane.b32.xlu2 %v668_v19, %s1105_s29 }
  0x58   : > { %744 = vrot.lane.b32.xlu0 %v738_v24, %s1106_s30  ;;  %807 = vst [vmem:[#allocation1] ss:$4 sm:$0xff] %v247_v0 }
  0x5f   : > { %v812_v25 = vld.sshfl [vmem:[#allocation1 + $0x10] sm:$0xff pattern:$0x73625140]  ;;  %v808_v26 = vld.sshfl [vmem:[#allocation1] sm:$0xff pattern:$0x73625140]  ;;  %742 = vrot.lane.b32.xlu2 %v736_v22, %s1106_s30  ;;  %s237_s30 = scalar_lea.vmem %s1266_s3, %s1075_s27 }
  0x60   : > { %818 = vrot.lane.b32.xlu0 %v812_v25, %s1107_s6  ;;  %814 = vrot.lane.b32.xlu1 %v808_v26, %s1107_s6  ;;  %v810_v27 = vld.sshfl [vmem:[#allocation1 + $0x8] sm:$0xff pattern:$0x73625140] }
  0x67   : > { %816 = vrot.lane.b32.xlu2 %v810_v27, %s1107_s6  ;;  %v1060_v27 = vld [vmem:[%s1263_s0 + $0x18] sm:$0xf] }
  0x84   : > { %v385_v30 = vpop.permute.xlu2 %384 }
  0x8a   : > { %v264_v31 = vpop.permute.xlu0 %263  ;;  %v262_v32 = vpop.permute.xlu1 %261 }
  0x8b   : > { %v267_v33 = vsel %vm265_vm2, %v262_v32, %v264_v31  ;;  %v280_v34 = vsel %vm272_vm0, %v264_v31, 0 }
  0x8c   : > { %v277_v36 = vsel %vm272_vm0, %v267_v33, 0  ;;  %315 = vmatpush.bf16.msra.mxu2 %v280_v34  ;;  %v387_v38 = vpop.permute.xlu2 %386 }
  0x8d   : > { %302 = vmatpush.bf16.msra.mxu1 %v277_v36  ;;  %v390_v39 = vsel %vm388_vm3, %v385_v30, %v387_v38  ;;  %v401_v46 = vsel %vm272_vm0, %v387_v38, 0  ;;  %v1064_v38 = vld [vmem:[%s1263_s0 + $0x1c] sm:$0xf] }
  0x8e   : > { %v398_v40 = vsel %vm272_vm0, %v390_v39, 0  ;;  %v1068_v39 = vld [vmem:[%s1263_s0 + $0x20] sm:$0xf] }
  0x8f   : > { %1040 = vmatmul.msk.bf16.vlgmr.msra.gmra.mxu2 %vm268_vm1, %v1037_v37  ;;  %423 = vmatpush.bf16.msrb.mxu3 %v398_v40 }
  0x90   : > { %1039 = vmatmul.msk.bf16.vlgmr.msra.gmra.mxu1 %vm268_vm1, %v1037_v37 }
  0x91   : > { %367 = vmatpush.bf16.msrb.mxu1 %v332_v35 }
  0x92   : > { %v260_v42 = vpop.permute.xlu0 %259  ;;  %1046 = vmatmul.msk.bf16.vlgmr.msrb.gmra.mxu3 %vm268_vm1, %v1044_v41 }
  0x93   : > { %v266_v43 = vsel %vm265_vm2, %v260_v42, %v262_v32 }
  0x94   : > { %v274_v45 = vsel %vm272_vm0, %v266_v43, 0  ;;  %v455_v50 = vpop.permute.xlu2 %454 }
  0x95   : > { %289 = vmatpush.bf16.msra.mxu0 %v274_v45 }
  0x98   : > { %1038 = vmatmul.msk.bf16.vlgmr.msra.gmra.mxu0 %vm268_vm1, %v1037_v37 }
  0x99   : > { %354 = vmatpush.bf16.msrb.mxu0 %v330_v44 }
  0x9c   : > { %v383_v47 = vpop.permute.xlu1 %382  ;;  %v529_v59 = vpop.permute.xlu2 %528 }
  0x9d   : > { %436 = vmatpush.bf16.msra.mxu0 %v401_v46  ;;  %v389_v48 = vsel %vm388_vm3, %v383_v47, %v385_v30 }
  0x9e   : > { %v395_v49 = vsel %vm272_vm0, %v389_v48, 0 }
  0x9f   : > { %410 = vmatpush.bf16.msrb.mxu2 %v395_v49 }
  0xa0   : > { %1043 = vmatmul.msk.bf16.vlgmr.msrb.gmra.mxu1 %vm268_vm1, %v248_v29 }
  0xa2   : > { %1045 = vmatmul.msk.bf16.vlgmr.msrb.gmra.mxu2 %vm268_vm1, %v1044_v41 }
  0xa5   : > { %v459_v51 = vpop.permute.xlu1 %458 }
  0xa6   : > { %v473_v52 = vsel %vm272_vm0, %v459_v51, 0  ;;  %v457_v53 = vpop.permute.xlu0 %456 }
  0xa7   : > { %v462_v54 = vsel %vm460_vm4, %v457_v53, %v459_v51  ;;  %v461_v55 = vsel %vm460_vm4, %v455_v50, %v457_v53  ;;  %508 = vmatpush.bf16.msra.mxu3 %v473_v52 }
  0xa8   : > { %1042 = vmatmul.msk.bf16.vlgmr.msrb.gmra.mxu0 %vm268_vm1, %v248_v29  ;;  %v470_v56 = vsel %vm272_vm0, %v462_v54, 0  ;;  %v467_v57 = vsel %vm272_vm0, %v461_v55, 0  ;;  %v343_v40 = vpop.f32.mrf.mxu3 }
  0xa9   : > { %482 = vmatpush.bf16.msra.mxu1 %v467_v57  ;;  %495 = vmatpush.bf16.msra.mxu2 %v470_v56  ;;  %v671_v3 = vpop.permute.xlu2 %670 }
  0xaa   : > { %1051 = vmatmul.msk.bf16.vlgmr.msra.gmra.mxu3 %vm268_vm1, %v1048_v58 }
  0xae   : > { %v531_v60 = vpop.permute.xlu0 %530 }
  0xaf   : > { %v545_v61 = vsel %vm272_vm0, %v531_v60, 0  ;;  %v527_v62 = vpop.permute.xlu1 %526  ;;  %v534_v63 = vsel %vm532_vm5, %v529_v59, %v531_v60 }
  0xb0   : > { %1049 = vmatmul.msk.bf16.vlgmr.msra.gmra.mxu1 %vm268_vm1, %v1048_v58  ;;  %v533_v0 = vsel %vm532_vm5, %v527_v62, %v529_v59  ;;  %v542_v1 = vsel %vm272_vm0, %v534_v63, 0  ;;  %580 = vmatpush.bf16.msrb.mxu2 %v545_v61 }
  0xb1   : > { %v539_v2 = vsel %vm272_vm0, %v533_v0, 0  ;;  %567 = vmatpush.bf16.msrb.mxu1 %v542_v1  ;;  %v675_v10 = vpop.permute.xlu2 %674 }
  0xb2   : > { %1050 = vmatmul.msk.bf16.vlgmr.msra.gmra.mxu2 %vm268_vm1, %v1048_v58  ;;  %554 = vmatpush.bf16.msrb.mxu0 %v539_v2  ;;  %v689_v20 = vsel %vm272_vm0, %v675_v10, 0 }
  0xb7   : > { %v601_v4 = vpop.permute.xlu1 %600  ;;  %v599_v5 = vpop.permute.xlu0 %598 }
  0xb8   : > { %1047 = vmatmul.msk.bf16.vlgmr.msra.gmra.mxu0 %vm268_vm1, %v1044_v41  ;;  %v605_v6 = vsel %vm604_vm6, %v599_v5, %v601_v4  ;;  %v345_v41 = vpop.f32.mrf.mxu3 }
  0xb9   : > { %v611_v7 = vsel %vm272_vm0, %v605_v6, 0  ;;  %v743_v21 = vpop.permute.xlu2 %742 }
  0xba   : > { %626 = vmatpush.bf16.msrb.mxu3 %v611_v7 }
  0xbd   : > { %1057 = vmatmul.msk.bf16.vlgmr.msrb.gmra.mxu3 %vm268_vm1, %v1056_v8 }
  0xbf   : > { %v603_v11 = vpop.permute.xlu1 %602 }
  0xc0   : > { %1054 = vmatmul.msk.bf16.vlgmr.msrb.gmra.mxu1 %vm268_vm1, %v1052_v9  ;;  %v606_v12 = vsel %vm604_vm6, %v601_v4, %v603_v11  ;;  %v617_v13 = vsel %vm272_vm0, %v603_v11, 0  ;;  %v673_v14 = vpop.permute.xlu0 %672 }
  0xc1   : > { %v614_v15 = vsel %vm272_vm0, %v606_v12, 0  ;;  %v677_v16 = vsel %vm676_vm7, %v671_v3, %v673_v14  ;;  %v678_v17 = vsel %vm676_vm7, %v673_v14, %v675_v10  ;;  %652 = vmatpush.bf16.msra.mxu1 %v617_v13  ;;  %v817_v30 = vpop.permute.xlu2 %816 }
  0xc2   : > { %1055 = vmatmul.msk.bf16.vlgmr.msrb.gmra.mxu2 %vm268_vm1, %v1052_v9  ;;  %639 = vmatpush.bf16.msra.mxu0 %v614_v15  ;;  %v683_v18 = vsel %vm272_vm0, %v677_v16, 0  ;;  %v686_v19 = vsel %vm272_vm0, %v678_v17, 0 }
  0xc3   : > { %698 = vmatpush.bf16.msra.mxu2 %v683_v18  ;;  %711 = vmatpush.bf16.msra.mxu3 %v686_v19 }
  0xc8   : > { %1053 = vmatmul.msk.bf16.vlgmr.msrb.gmra.mxu0 %vm268_vm1, %v1052_v9 }
  0xc9   : > { %724 = vmatpush.bf16.msrb.mxu0 %v689_v20  ;;  %v747_v22 = vpop.permute.xlu1 %746 }
  0xca   : > { %v761_v23 = vsel %vm272_vm0, %v747_v22, 0  ;;  %v745_v24 = vpop.permute.xlu0 %744 }
  0xcb   : > { %v750_v25 = vsel %vm748_vm8, %v745_v24, %v747_v22  ;;  %v749_v26 = vsel %vm748_vm8, %v743_v21, %v745_v24  ;;  %796 = vmatpush.bf16.msrb.mxu3 %v761_v23 }
  0xcc   : > { %v758_v28 = vsel %vm272_vm0, %v750_v25, 0  ;;  %v755_v29 = vsel %vm272_vm0, %v749_v26, 0 }
  0xcd   : > { %1062 = vmatmul.msk.bf16.vlgmr.msra.gmra.mxu3 %vm268_vm1, %v1060_v27  ;;  %770 = vmatpush.bf16.msrb.mxu1 %v755_v29 }
  0xce   : > { %783 = vmatpush.bf16.msrb.mxu2 %v758_v28 }
  0xd0   : > { %1059 = vmatmul.msk.bf16.vlgmr.msra.gmra.mxu1 %vm268_vm1, %v1056_v8 }
  0xd2   : > { %1061 = vmatmul.msk.bf16.vlgmr.msra.gmra.mxu2 %vm268_vm1, %v1060_v27  ;;  %v819_v31 = vpop.permute.xlu0 %818  ;;  %v815_v32 = vpop.permute.xlu1 %814 }
  0xd3   : > { %v833_v33 = vsel %vm272_vm0, %v819_v31, 0  ;;  %v822_v34 = vsel %vm820_vm9, %v817_v30, %v819_v31  ;;  %v821_v35 = vsel %vm820_vm9, %v815_v32, %v817_v30 }
  0xd4   : > { %v830_v36 = vsel %vm272_vm0, %v822_v34, 0  ;;  %868 = vmatpush.bf16.msra.mxu2 %v833_v33  ;;  %v827_v37 = vsel %vm272_vm0, %v821_v35, 0 }
  0xd5   : > { %855 = vmatpush.bf16.msra.mxu1 %v830_v36 }
  0xd8   : > { %1058 = vmatmul.msk.bf16.vlgmr.msra.gmra.mxu0 %vm268_vm1, %v1056_v8 }
  0xd9   : > { %842 = vmatpush.bf16.msra.mxu0 %v827_v37 }
  0xdd   : > { %1067 = vmatmul.msk.bf16.vlgmr.msrb.gmra.mxu3 %vm268_vm1, %v1064_v38 }
  0xe0   : > { %1065 = vmatmul.msk.bf16.vlgmr.msrb.gmra.mxu1 %vm268_vm1, %v1064_v38 }
  0xe2   : > { %1066 = vmatmul.msk.bf16.vlgmr.msrb.gmra.mxu2 %vm268_vm1, %v1064_v38 }
  0xe8   : > { %1063 = vmatmul.msk.bf16.vlgmr.msrb.gmra.mxu0 %vm268_vm1, %v1060_v27 }
  0xf0   : > { %1070 = vmatmul.msk.bf16.vlgmr.msra.gmra.mxu1 %vm268_vm1, %v1068_v39 }
  0xf2   : > { %1071 = vmatmul.msk.bf16.vlgmr.msra.gmra.mxu2 %vm268_vm1, %v1068_v39 }
  0xf8   : > { %1069 = vmatmul.msk.bf16.vlgmr.msra.gmra.mxu0 %vm268_vm1, %v1068_v39 }
 0x10d   : > { %v304_v42 = vpop.f32.mrf.mxu1 }
 0x112   : > { %v317_v43 = vpop.f32.mrf.mxu2 }
 0x115   : > { %v291_v44 = vpop.f32.mrf.mxu0  ;;  %v306_v45 = vpop.f32.mrf.mxu1 }
 0x116   : > { %v344_v46 = vadd.f32 %v343_v40, %v291_v44  ;;  %v425_v47 = vpop.f32.mrf.mxu3  ;;  %v881_v44 = vld [vmem:[%s1265_s2] sm:$0x7] }
 0x11a   : > { %v319_v48 = vpop.f32.mrf.mxu2 }
 0x11d   : > { %v293_v49 = vpop.f32.mrf.mxu0  ;;  %v369_v50 = vpop.f32.mrf.mxu1 }
 0x11e   : > { %v370_v51 = vadd.f32 %v369_v50, %v317_v43  ;;  %v427_v52 = vpop.f32.mrf.mxu3  ;;  %v883_v49 = vperm.slane %v881_v44, 0  ;;  %v885_v50 = vperm.slane %v881_v44, 2 }
 0x125   : > { %v412_v53 = vpop.f32.mrf.mxu2  ;;  %v356_v54 = vpop.f32.mrf.mxu0 }
 0x126   : > { %v442_v55 = vadd.f32 %v412_v53, %v344_v46  ;;  %v357_v56 = vadd.f32 %v356_v54, %v304_v42  ;;  %v371_v57 = vpop.f32.mrf.mxu1  ;;  %v884_v46 = vperm.slane %v881_v44, 1 }
 0x128   : > { %v443_v58 = vadd.f32 %v425_v47, %v357_v56 }
 0x12d   : > { %v414_v59 = vpop.f32.mrf.mxu2  ;;  %v358_v60 = vpop.f32.mrf.mxu0 }
 0x12e   : > { %v484_v61 = vpop.f32.mrf.mxu1  ;;  %v510_v62 = vpop.f32.mrf.mxu3 }
 0x12f   : > { %v514_v31 = vadd.f32 %v484_v61, %v442_v55 }
 0x135   : > { %v497_v63 = vpop.f32.mrf.mxu2  ;;  %v438_v0 = vpop.f32.mrf.mxu0 }
 0x136   : > { %v486_v1 = vpop.f32.mrf.mxu1  ;;  %v512_v2 = vpop.f32.mrf.mxu3  ;;  %v515_v23 = vadd.f32 %v497_v63, %v443_v58  ;;  %v444_v27 = vadd.f32 %v438_v0, %v370_v51 }
 0x138   : > { %v516_v32 = vadd.f32 %v510_v62, %v444_v27 }
 0x13d   : > { %v499_v3 = vpop.f32.mrf.mxu2  ;;  %v440_v4 = vpop.f32.mrf.mxu0 }
 0x13e   : > { %v569_v5 = vpop.f32.mrf.mxu1 }
 0x13f   : > { %v587_v24 = vadd.f32 %v569_v5, %v515_v23 }
 0x140   : > { %v628_v6 = vpop.f32.mrf.mxu3 }
 0x145   : > { %v582_v7 = vpop.f32.mrf.mxu2  ;;  %v556_v8 = vpop.f32.mrf.mxu0 }
 0x146   : > { %v571_v9 = vpop.f32.mrf.mxu1  ;;  %v588_v34 = vadd.f32 %v582_v7, %v516_v32  ;;  %v586_v35 = vadd.f32 %v556_v8, %v514_v31 }
 0x148   : > { %v630_v10 = vpop.f32.mrf.mxu3  ;;  %v658_v42 = vadd.f32 %v628_v6, %v586_v35 }
 0x14d   : > { %v584_v11 = vpop.f32.mrf.mxu2  ;;  %v558_v12 = vpop.f32.mrf.mxu0 }
 0x14e   : > { %v654_v13 = vpop.f32.mrf.mxu1 }
 0x14f   : > { %v660_v39 = vadd.f32 %v654_v13, %v588_v34 }
 0x150   : > { %v713_v14 = vpop.f32.mrf.mxu3 }
 0x155   : > { %v700_v15 = vpop.f32.mrf.mxu2  ;;  %v641_v16 = vpop.f32.mrf.mxu0 }
 0x156   : > { %v656_v17 = vpop.f32.mrf.mxu1  ;;  %v659_v29 = vadd.f32 %v641_v16, %v587_v24  ;;  %v730_v45 = vadd.f32 %v700_v15, %v658_v42 }
 0x158   : > { %v715_v18 = vpop.f32.mrf.mxu3  ;;  %v731_v33 = vadd.f32 %v713_v14, %v659_v29 }
 0x15d   : > { %v702_v19 = vpop.f32.mrf.mxu2  ;;  %v643_v20 = vpop.f32.mrf.mxu0 }
 0x15e   : > { %v772_v21 = vpop.f32.mrf.mxu1 }
 0x15f   : > { %v802_v47 = vadd.f32 %v772_v21, %v730_v45 }
 0x160   : > { %v798_v22 = vpop.f32.mrf.mxu3 }
 0x165   : > { %v785_v25 = vpop.f32.mrf.mxu2  ;;  %v726_v26 = vpop.f32.mrf.mxu0 }
 0x166   : > { %v774_v28 = vpop.f32.mrf.mxu1  ;;  %v803_v36 = vadd.f32 %v785_v25, %v731_v33  ;;  %v732_v43 = vadd.f32 %v726_v26, %v660_v39 }
 0x168   : > { %v800_v30 = vpop.f32.mrf.mxu3  ;;  %v804_v48 = vadd.f32 %v798_v22, %v732_v43 }
 0x16d   : > { %v787_v37 = vpop.f32.mrf.mxu2  ;;  %v728_v38 = vpop.f32.mrf.mxu0 }
 0x16e   : > { %v857_v40 = vpop.f32.mrf.mxu1 }
 0x16f   : > { %v875_v41 = vadd.f32 %v857_v40, %v803_v36 }
 0x171   : > { %878 = vst [vmem:[%s237_s30 + $0x8] sm:$0xff] %v875_v41  ;;  %v900_v53 = vmul.f32 %v875_v41, %v875_v41  ;;  %v890_v57 = vmul.f32 %v884_v46, %v875_v41 }
 0x173   : > { %v903_v0 = vmul.f32 %v900_v53, %v884_v46 }
 0x175   : > { %v870_v51 = vpop.f32.mrf.mxu2  ;;  %v844_v52 = vpop.f32.mrf.mxu0 }
 0x176   : > { %v876_v54 = vadd.f32 %v870_v51, %v804_v48  ;;  %v874_v55 = vadd.f32 %v844_v52, %v802_v47  ;;  %v859_v56 = vpop.f32.mrf.mxu1 }
 0x178   : > { %v901_v58 = vmul.f32 %v876_v54, %v876_v54  ;;  %877 = vst [vmem:[%s237_s30] sm:$0xff] %v874_v55  ;;  %v889_v59 = vmul.f32 %v883_v49, %v874_v55  ;;  %v899_v60 = vmul.f32 %v874_v55, %v874_v55  ;;  %v891_v61 = vmul.f32 %v885_v50, %v876_v54 }
 0x179   : > { %880 = vst.msk [vmem:[%s237_s30 + $0x10] sm:$0xff] %vm879_vm10, %v876_v54 }
 0x17a   : > { %v892_v62 = vadd.f32 %v890_v57, %v889_v59  ;;  %v902_v63 = vmul.f32 %v899_v60, %v883_v49  ;;  %v904_v1 = vmul.f32 %v901_v58, %v885_v50  ;;  %v893_v2 = vsel %vm879_vm10, %v891_v61, 0.0 }
 0x17c   : > { %v894_v3 = vadd.f32 %v893_v2, %v892_v62  ;;  %v905_v4 = vadd.f32 %v903_v0, %v902_v63  ;;  %v906_v7 = vsel %vm879_vm10, %v904_v1, 0.0 }
 0x17d   : > { %v846_v5 = vpop.f32.mrf.mxu0  ;;  %v872_v6 = vpop.f32.mrf.mxu2 }
 0x17e   : > { %895 = vadd.xlane.f32.xlu0 %v894_v3  ;;  %v907_v8 = vadd.f32 %v906_v7, %v905_v4 }
 0x180   : > { %908 = vadd.xlane.f32.xlu1 %v907_v8 }
 0x1f1   : > { %v896_v9 = vpop.xlane.xlu0 %895 }
 0x1f2   : > { %898 = vst.msk [vmem:[%s241_s11] sm:$0xff] %vm897_vm11, %v896_v9 }
 0x1f3   : > { %v909_v10 = vpop.xlane.xlu1 %908 }
 0x1f4   : > { %910 = vst.msk [vmem:[%s245_s14] sm:$0xff] %vm897_vm11, %v909_v10 }
 0x1f5 PF: > { %s16_s18 = sadd.s32 1, %s1098_s18  }
 0x1f6   : > { %p13_p4 = scmp.ge.s32.totalorder %s16_s18, 4  }
 0x1f8   :  { %15 = sbr.rel (!%p13_p4) target bundleno = 1 (0x1), region = 94 }

</bundles_post_ra>
